<compile_context>
chip_gen: v6e
topology: v6e:2x2x1
jax: 0.10.0
libtpu: 0.0.40
codegen_flags: <defaults>
</compile_context>

<pallas_src>
import jax
import jax.numpy as jnp
from jax.experimental import pallas as pl
from jax.experimental.pallas import tpu as pltpu


# ------------------------------ Pallas kernel -------------------------------

def _make_kernel(W: int, pad: int):
    """Kernel factory; W (image width) and the lane pad are static."""

    def kernel(buf_ref, s1_ref, b1_ref, w1t_ref, s2_ref, b2_ref, w2t_ref,
               out_ref):
        # buf_ref : (1, cin_blk, M) f32   x channels of the aliased concat buffer
        # s1,b1   : (C, 1) f32            folded BN1 scale / shift
        # w1t     : (inner, C) bf16       1x1 conv weight, transposed
        # s2,b2   : (inner, 1) f32        folded BN2 scale / shift
        # w2t     : (gr, 9*inner) bf16    3x3 conv weight, (ky,kx,i) flattened, transposed
        # out_ref : (1, C+gr, M) f32      concat block (x passthrough + new features)
        C = s1_ref.shape[0]
        inner = w1t_ref.shape[0]
        M = out_ref.shape[2]

        # ---- BN1 (folded) + ReLU, 1x1 conv as one MXU matmul (f32 math, bf16 at the dot)
        x = buf_ref[0, :C, :]                                        # (C, M) lane-dense
        a1 = jnp.maximum(x * s1_ref[...] + b1_ref[...], 0.0)         # (C, M) f32
        h = jnp.dot(w1t_ref[...], a1.astype(jnp.bfloat16),
                    preferred_element_type=jnp.float32)              # (inner, M) f32

        # ---- BN2 (folded) + ReLU; single cast for the 3x3 matmul
        a2 = jnp.maximum(h * s2_ref[...] + b2_ref[...], 0.0).astype(jnp.bfloat16)

        # ---- build the 9-tap im2col slab with static lane shifts
        # Zero lane-padding makes every tap a static slice (row over/underflow
        # lands in the pad); only the dx=+-1 taps need a column-border mask.
        zeros = jnp.zeros((inner, pad), jnp.bfloat16)
        a2p = jnp.concatenate([zeros, a2, zeros], axis=1)            # (inner, M + 2*pad)

        col = jax.lax.broadcasted_iota(jnp.int32, (1, M), 1) % W     # x coordinate
        m_left = (col > 0).astype(jnp.bfloat16)                      # valid when reading x-1
        m_right = (col < (W - 1)).astype(jnp.bfloat16)               # valid when reading x+1

        taps = []
        for ry in (-1, 0, 1):            # kernel row  ky = ry + 1
            for rx in (-1, 0, 1):        # kernel col  kx = rx + 1
                s = pad + ry * W + rx
                t = a2p[:, s:s + M]                                  # (inner, M) bf16
                if rx == -1:
                    t = t * m_left
                elif rx == 1:
                    t = t * m_right
                taps.append(t)
        slab = jnp.concatenate(taps, axis=0)                         # (9*inner, M)

        # ---- 3x3 conv as ONE MXU matmul with K = 9*inner
        new = jnp.dot(w2t_ref[...], slab,
                      preferred_element_type=jnp.float32)            # (gr, M) f32

        # ---- concatenated output block: x passthrough (sublane-aligned copy) + new
        out_ref[0, :C, :] = x
        out_ref[0, C:, :] = new

    return kernel


# ------------------------------ kernel wrapper -------------------------------

@jax.jit
def bottleneck_forward(x_nchw, params):
    N, C, H, W = x_nchw.shape
    M = H * W
    w1t = params["w1t_bf16"]
    w2t = params["w2t_bf16"]
    inner = w1t.shape[0]
    gr = w2t.shape[0]

    s1 = params["scale1"].reshape(C, 1)
    b1 = params["shift1"].reshape(C, 1)
    s2 = params["scale2"].reshape(inner, 1)
    b2 = params["shift2"].reshape(inner, 1)

    # Concat buffer with x already in channels [0, C); aliased to the kernel
    # output so no separate torch.cat copy is emitted.  In a stacked DenseNet
    # this buffer is simply carried (and re-aliased) from layer to layer.
    buf = jnp.pad(x_nchw.reshape(N, C, M), ((0, 0), (0, gr), (0, 0)))

    # x-read block: smallest sublane-aligned channel count covering C.
    cin_blk = min(C + gr, ((C + 7) // 8) * 8)
    # lane padding for the 9 static tap shifts (>= W+1, rounded to a lane tile)
    pad = ((W + 1 + 127) // 128) * 128

    # grid=(N,), "parallel": N=2 keeps both v7x TensorCores busy.  On single-TC
    # v5e/v6e, several images per step would amortize per-step overhead, but
    # that would serialize v7x here, so one image per step is kept.
    out = pl.pallas_call(
        _make_kernel(W, pad),
        out_shape=jax.ShapeDtypeStruct((N, C + gr, M), jnp.float32),
        grid=(N,),
        in_specs=[
            pl.BlockSpec((1, cin_blk, M), lambda b: (b, 0, 0)),   # aliased concat buf (x read)
            pl.BlockSpec((C, 1), lambda b: (0, 0)),               # BN1 scale
            pl.BlockSpec((C, 1), lambda b: (0, 0)),               # BN1 shift
            pl.BlockSpec((inner, C), lambda b: (0, 0)),           # w1^T
            pl.BlockSpec((inner, 1), lambda b: (0, 0)),           # BN2 scale
            pl.BlockSpec((inner, 1), lambda b: (0, 0)),           # BN2 shift
            pl.BlockSpec((gr, 9 * inner), lambda b: (0, 0)),      # w2 (flattened, transposed)
        ],
        out_specs=pl.BlockSpec((1, C + gr, M), lambda b: (b, 0, 0)),
        input_output_aliases={0: 0},
        compiler_params=pltpu.CompilerParams(
            dimension_semantics=("parallel",)),
    )(buf, s1, b1, w1t, s2, b2, w2t)

    return out.reshape(N, C + gr, H, W)


# ------------------------------ parameter init -------------------------------

def make_params(key, in_channels, growth_rate, eps=1e-5):
    inner = 4 * growth_rate
    ks = jax.random.split(key, 10)

    def bn_fold(kg, kb, km, kv, c):
        gamma = jax.random.uniform(kg, (c,), minval=0.5, maxval=1.5)
        beta = jax.random.normal(kb, (c,)) * 0.1
        mean = jax.random.normal(km, (c,)) * 0.1
        var = jax.random.uniform(kv, (c,), minval=0.5, maxval=1.5)
        scale = gamma / jnp.sqrt(var + eps)
        shift = beta - mean * scale
        return scale.astype(jnp.float32), shift.astype(jnp.float32)

    scale1, shift1 = bn_fold(ks[0], ks[1], ks[2], ks[3], in_channels)
    scale2, shift2 = bn_fold(ks[4], ks[5], ks[6], ks[7], inner)
    w1 = (jax.random.normal(ks[8], (in_channels, inner))
          * (2.0 / in_channels) ** 0.5).astype(jnp.float32)          # (C, inner)
    w2 = (jax.random.normal(ks[9], (3, 3, inner, growth_rate))
          * (2.0 / (9 * inner)) ** 0.5).astype(jnp.float32)          # HWIO
    return {
        "scale1": scale1, "shift1": shift1,
        "scale2": scale2, "shift2": shift2,
        "w1_f32": w1, "w2_f32": w2,
        # weights pre-shaped for the kernel (no per-step in-kernel relayout)
        "w1t_bf16": jnp.transpose(w1).astype(jnp.bfloat16),                        # (inner, C)
        "w2t_bf16": jnp.transpose(
            w2.reshape(9 * inner, growth_rate)).astype(jnp.bfloat16),              # (gr, 9*inner)
    }


# ------------------------------ pure-JAX reference ---------------------------

def bottleneck_reference(x_nchw, params):
    s1 = params["scale1"][None, :, None, None]
    b1 = params["shift1"][None, :, None, None]
    a1 = jnp.maximum(x_nchw * s1 + b1, 0.0)
    h = jnp.einsum("nchw,cf->nfhw", a1, params["w1_f32"],
                   precision=jax.lax.Precision.HIGHEST)
    s2 = params["scale2"][None, :, None, None]
    b2 = params["shift2"][None, :, None, None]
    a2 = jnp.maximum(h * s2 + b2, 0.0)
    new = jax.lax.conv_general_dilated(
        a2, params["w2_f32"], window_strides=(1, 1), padding="SAME",
        dimension_numbers=("NCHW", "HWIO", "NCHW"),
        precision=jax.lax.Precision.HIGHEST)
    return jnp.concatenate([x_nchw, new], axis=1)


# ---------------------------------- main -------------------------------------

if __name__ == "__main__":
    key = jax.random.PRNGKey(0)
    kx, kp = jax.random.split(key)
    N, C, H, W = 2, 24, 16, 16
    growth_rate = 12

    x_nchw = jax.random.normal(kx, (N, C, H, W), dtype=jnp.float32)
    params = make_params(kp, C, growth_rate)

    out = jax.block_until_ready(bottleneck_forward(x_nchw, params))
    assert out.shape == (N, C + growth_rate, H, W), out.shape
    assert bool(jnp.all(jnp.isfinite(out)))

    # x passthrough (channels 0:C) must be exact
    assert float(jnp.max(jnp.abs(out[:, :C] - x_nchw))) == 0.0

    ref = bottleneck_reference(x_nchw, params)
    max_err = float(jnp.max(jnp.abs(out - ref)))
    assert max_err < 1e-1, max_err

    print("KERNEL_OK")
</pallas_src>

<mosaic_0001>
module attributes {stable_mosaic.version = 11 : i64} {
  func.func @kernel(%arg0: i32, %arg1: memref<1x24x256xf32, #tpu.memory_space<vmem>>, %arg2: memref<24x1xf32, #tpu.memory_space<vmem>>, %arg3: memref<24x1xf32, #tpu.memory_space<vmem>>, %arg4: memref<48x24xbf16, #tpu.memory_space<vmem>>, %arg5: memref<48x1xf32, #tpu.memory_space<vmem>>, %arg6: memref<48x1xf32, #tpu.memory_space<vmem>>, %arg7: memref<12x432xbf16, #tpu.memory_space<vmem>>, %arg8: memref<1x36x256xf32, #tpu.memory_space<vmem>>) attributes {dimension_semantics = [#tpu.dimension_semantics<parallel>], iteration_bounds = array<i64: 2>, scalar_prefetch = 0 : i64, scratch_operands = 0 : i64, tpu.core_type = #tpu.core_type<tc>, window_params = [{transform_indices = @transform_0, window_bounds = array<i64: 1, 24, 256>}, {pipeline_mode = #tpu.pipeline_mode<synchronous>, transform_indices = @transform_1, window_bounds = array<i64: 24, 1>}, {pipeline_mode = #tpu.pipeline_mode<synchronous>, transform_indices = @transform_2, window_bounds = array<i64: 24, 1>}, {pipeline_mode = #tpu.pipeline_mode<synchronous>, transform_indices = @transform_3, window_bounds = array<i64: 48, 24>}, {pipeline_mode = #tpu.pipeline_mode<synchronous>, transform_indices = @transform_4, window_bounds = array<i64: 48, 1>}, {pipeline_mode = #tpu.pipeline_mode<synchronous>, transform_indices = @transform_5, window_bounds = array<i64: 48, 1>}, {pipeline_mode = #tpu.pipeline_mode<synchronous>, transform_indices = @transform_6, window_bounds = array<i64: 12, 432>}, {transform_indices = @transform_7, window_bounds = array<i64: 1, 36, 256>}]} {
    %c0 = arith.constant 0 : index
    %c0_0 = arith.constant 0 : index
    %c0_1 = arith.constant 0 : index
    %0 = vector.load %arg1[%c0, %c0_0, %c0_1] : memref<1x24x256xf32, #tpu.memory_space<vmem>>, vector<1x24x256xf32>
    %1 = vector.shape_cast %0 : vector<1x24x256xf32> to vector<24x256xf32>
    %c0_2 = arith.constant 0 : index
    %c0_3 = arith.constant 0 : index
    %2 = vector.load %arg2[%c0_2, %c0_3] : memref<24x1xf32, #tpu.memory_space<vmem>>, vector<24x1xf32>
    %3 = vector.broadcast %2 : vector<24x1xf32> to vector<24x256xf32>
    %4 = arith.mulf %1, %3 : vector<24x256xf32>
    %c0_4 = arith.constant 0 : index
    %c0_5 = arith.constant 0 : index
    %5 = vector.load %arg3[%c0_4, %c0_5] : memref<24x1xf32, #tpu.memory_space<vmem>>, vector<24x1xf32>
    %6 = vector.broadcast %5 : vector<24x1xf32> to vector<24x256xf32>
    %7 = arith.addf %4, %6 : vector<24x256xf32>
    %cst = arith.constant 0.000000e+00 : f32
    %8 = vector.broadcast %cst : f32 to vector<24x256xf32>
    %9 = arith.maximumf %7, %8 : vector<24x256xf32>
    %c0_6 = arith.constant 0 : index
    %c0_7 = arith.constant 0 : index
    %10 = vector.load %arg4[%c0_6, %c0_7] : memref<48x24xbf16, #tpu.memory_space<vmem>>, vector<48x24xbf16>
    %11 = arith.truncf %9 : vector<24x256xf32> to vector<24x256xbf16>
    %cst_8 = arith.constant dense<0.000000e+00> : vector<48x256xf32>
    %12 = tpu.matmul %10, %11, %cst_8 {dimension_numbers = #tpu.dot_dimension_numbers<[1], [0], [0], [1], [0, 0, 1, 1], [], []>} : vector<48x24xbf16>, vector<24x256xbf16>, vector<48x256xf32> -> vector<48x256xf32>
    %c0_9 = arith.constant 0 : index
    %c0_10 = arith.constant 0 : index
    %13 = vector.load %arg5[%c0_9, %c0_10] : memref<48x1xf32, #tpu.memory_space<vmem>>, vector<48x1xf32>
    %14 = vector.broadcast %13 : vector<48x1xf32> to vector<48x256xf32>
    %15 = arith.mulf %12, %14 : vector<48x256xf32>
    %c0_11 = arith.constant 0 : index
    %c0_12 = arith.constant 0 : index
    %16 = vector.load %arg6[%c0_11, %c0_12] : memref<48x1xf32, #tpu.memory_space<vmem>>, vector<48x1xf32>
    %17 = vector.broadcast %16 : vector<48x1xf32> to vector<48x256xf32>
    %18 = arith.addf %15, %17 : vector<48x256xf32>
    %cst_13 = arith.constant 0.000000e+00 : f32
    %19 = vector.broadcast %cst_13 : f32 to vector<48x256xf32>
    %20 = arith.maximumf %18, %19 : vector<48x256xf32>
    %21 = arith.truncf %20 : vector<48x256xf32> to vector<48x256xbf16>
    %cst_14 = arith.constant 0.000000e+00 : bf16
    %22 = vector.broadcast %cst_14 : bf16 to vector<48x128xbf16>
    %23 = tpu.concatenate %22, %21, %22 in 1 : vector<48x128xbf16>, vector<48x256xbf16>, vector<48x128xbf16> -> vector<48x512xbf16>
    %24 = tpu.iota {dimensions = array<i32: 1>} : vector<1x256xi32>
    %c16_i32 = arith.constant 16 : i32
    %c0_i32 = arith.constant 0 : i32
    %25 = arith.cmpi eq, %c16_i32, %c0_i32 : i32
    %c1_i32 = arith.constant 1 : i32
    %26 = arith.select %25, %c1_i32, %c16_i32 : i32
    %27 = vector.broadcast %26 : i32 to vector<1x256xi32>
    %28 = arith.remsi %24, %27 : vector<1x256xi32>
    %c0_i32_15 = arith.constant 0 : i32
    %29 = vector.broadcast %c0_i32_15 : i32 to vector<1x256xi32>
    %30 = arith.cmpi ne, %28, %29 : vector<1x256xi32>
    %c0_i32_16 = arith.constant 0 : i32
    %31 = vector.broadcast %c0_i32_16 : i32 to vector<1x256xi32>
    %32 = arith.cmpi slt, %28, %31 : vector<1x256xi32>
    %c0_i32_17 = arith.constant 0 : i32
    %33 = arith.cmpi slt, %26, %c0_i32_17 : i32
    %34 = vector.broadcast %33 : i1 to vector<1x256xi1>
    %35 = vector.broadcast %34 : vector<1x256xi1> to vector<1x256xi1>
    %36 = arith.xori %32, %35 : vector<1x256xi1>
    %37 = arith.andi %36, %30 : vector<1x256xi1>
    %38 = vector.broadcast %26 : i32 to vector<1x256xi32>
    %39 = arith.addi %28, %38 : vector<1x256xi32>
    %40 = arith.select %37, %39, %28 : vector<1x256xi1>, vector<1x256xi32>
    %c0_i32_18 = arith.constant 0 : i32
    %41 = vector.broadcast %c0_i32_18 : i32 to vector<1x256xi32>
    %42 = arith.cmpi sgt, %40, %41 : vector<1x256xi32>
    %43 = arith.extui %42 : vector<1x256xi1> to vector<1x256xi32>
    %44 = arith.sitofp %43 : vector<1x256xi32> to vector<1x256xf32>
    %45 = arith.truncf %44 : vector<1x256xf32> to vector<1x256xbf16>
    %c15_i32 = arith.constant 15 : i32
    %46 = vector.broadcast %c15_i32 : i32 to vector<1x256xi32>
    %47 = arith.cmpi slt, %40, %46 : vector<1x256xi32>
    %48 = arith.extui %47 : vector<1x256xi1> to vector<1x256xi32>
    %49 = arith.sitofp %48 : vector<1x256xi32> to vector<1x256xf32>
    %50 = arith.truncf %49 : vector<1x256xf32> to vector<1x256xbf16>
    %51 = vector.extract_strided_slice %23 {offsets = [0, 111], sizes = [48, 256], strides = [1, 1]} : vector<48x512xbf16> to vector<48x256xbf16>
    %52 = vector.broadcast %45 : vector<1x256xbf16> to vector<48x256xbf16>
    %53 = arith.mulf %51, %52 : vector<48x256xbf16>
    %54 = vector.extract_strided_slice %23 {offsets = [0, 112], sizes = [48, 256], strides = [1, 1]} : vector<48x512xbf16> to vector<48x256xbf16>
    %55 = vector.extract_strided_slice %23 {offsets = [0, 113], sizes = [48, 256], strides = [1, 1]} : vector<48x512xbf16> to vector<48x256xbf16>
    %56 = vector.broadcast %50 : vector<1x256xbf16> to vector<48x256xbf16>
    %57 = arith.mulf %55, %56 : vector<48x256xbf16>
    %58 = vector.extract_strided_slice %23 {offsets = [0, 127], sizes = [48, 256], strides = [1, 1]} : vector<48x512xbf16> to vector<48x256xbf16>
    %59 = vector.broadcast %45 : vector<1x256xbf16> to vector<48x256xbf16>
    %60 = arith.mulf %58, %59 : vector<48x256xbf16>
    %61 = vector.extract_strided_slice %23 {offsets = [0, 128], sizes = [48, 256], strides = [1, 1]} : vector<48x512xbf16> to vector<48x256xbf16>
    %62 = vector.extract_strided_slice %23 {offsets = [0, 129], sizes = [48, 256], strides = [1, 1]} : vector<48x512xbf16> to vector<48x256xbf16>
    %63 = vector.broadcast %50 : vector<1x256xbf16> to vector<48x256xbf16>
    %64 = arith.mulf %62, %63 : vector<48x256xbf16>
    %65 = vector.extract_strided_slice %23 {offsets = [0, 143], sizes = [48, 256], strides = [1, 1]} : vector<48x512xbf16> to vector<48x256xbf16>
    %66 = vector.broadcast %45 : vector<1x256xbf16> to vector<48x256xbf16>
    %67 = arith.mulf %65, %66 : vector<48x256xbf16>
    %68 = vector.extract_strided_slice %23 {offsets = [0, 144], sizes = [48, 256], strides = [1, 1]} : vector<48x512xbf16> to vector<48x256xbf16>
    %69 = vector.extract_strided_slice %23 {offsets = [0, 145], sizes = [48, 256], strides = [1, 1]} : vector<48x512xbf16> to vector<48x256xbf16>
    %70 = vector.broadcast %50 : vector<1x256xbf16> to vector<48x256xbf16>
    %71 = arith.mulf %69, %70 : vector<48x256xbf16>
    %72 = tpu.concatenate %53, %54, %57, %60, %61, %64, %67, %68, %71 in 0 : vector<48x256xbf16>, vector<48x256xbf16>, vector<48x256xbf16>, vector<48x256xbf16>, vector<48x256xbf16>, vector<48x256xbf16>, vector<48x256xbf16>, vector<48x256xbf16>, vector<48x256xbf16> -> vector<432x256xbf16>
    %c0_19 = arith.constant 0 : index
    %c0_20 = arith.constant 0 : index
    %73 = vector.load %arg7[%c0_19, %c0_20] : memref<12x432xbf16, #tpu.memory_space<vmem>>, vector<12x432xbf16>
    %cst_21 = arith.constant dense<0.000000e+00> : vector<12x256xf32>
    %74 = tpu.matmul %73, %72, %cst_21 {dimension_numbers = #tpu.dot_dimension_numbers<[1], [0], [0], [1], [0, 0, 1, 1], [], []>} : vector<12x432xbf16>, vector<432x256xbf16>, vector<12x256xf32> -> vector<12x256xf32>
    %c0_22 = arith.constant 0 : index
    %c0_23 = arith.constant 0 : index
    %c0_24 = arith.constant 0 : index
    %75 = vector.load %arg8[%c0_22, %c0_23, %c0_24] : memref<1x36x256xf32, #tpu.memory_space<vmem>>, vector<1x24x256xf32>
    %76 = vector.shape_cast %75 : vector<1x24x256xf32> to vector<24x256xf32>
    %77 = vector.shape_cast %1 : vector<24x256xf32> to vector<1x24x256xf32>
    tpu.vector_store %arg8[%c0_22, %c0_23, %c0_24], %77 {strides = array<i32>} : memref<1x36x256xf32, #tpu.memory_space<vmem>>, vector<1x24x256xf32>,
    %c0_25 = arith.constant 0 : index
    %c24 = arith.constant 24 : index
    %c0_26 = arith.constant 0 : index
    %78 = vector.load %arg8[%c0_25, %c24, %c0_26] : memref<1x36x256xf32, #tpu.memory_space<vmem>>, vector<1x12x256xf32>
    %79 = vector.shape_cast %78 : vector<1x12x256xf32> to vector<12x256xf32>
    %80 = vector.shape_cast %74 : vector<12x256xf32> to vector<1x12x256xf32>
    tpu.vector_store %arg8[%c0_25, %c24, %c0_26], %80 {strides = array<i32>} : memref<1x36x256xf32, #tpu.memory_space<vmem>>, vector<1x12x256xf32>,
    return
  }
  func.func @transform_0(%arg0: i32) -> (i32, i32, i32) {
    %c0_i32 = arith.constant 0 : i32
    %c0_i32_0 = arith.constant 0 : i32
    %c0_i32_1 = arith.constant 0 : i32
    return %arg0, %c0_i32, %c0_i32_0 : i32, i32, i32
  }
  func.func @transform_1(%arg0: i32) -> (i32, i32) {
    %c0_i32 = arith.constant 0 : i32
    %c0_i32_0 = arith.constant 0 : i32
    %c0_i32_1 = arith.constant 0 : i32
    return %c0_i32, %c0_i32_0 : i32, i32
  }
  func.func @transform_2(%arg0: i32) -> (i32, i32) {
    %c0_i32 = arith.constant 0 : i32
    %c0_i32_0 = arith.constant 0 : i32
    %c0_i32_1 = arith.constant 0 : i32
    return %c0_i32, %c0_i32_0 : i32, i32
  }
  func.func @transform_3(%arg0: i32) -> (i32, i32) {
    %c0_i32 = arith.constant 0 : i32
    %c0_i32_0 = arith.constant 0 : i32
    %c0_i32_1 = arith.constant 0 : i32
    return %c0_i32, %c0_i32_0 : i32, i32
  }
  func.func @transform_4(%arg0: i32) -> (i32, i32) {
    %c0_i32 = arith.constant 0 : i32
    %c0_i32_0 = arith.constant 0 : i32
    %c0_i32_1 = arith.constant 0 : i32
    return %c0_i32, %c0_i32_0 : i32, i32
  }
  func.func @transform_5(%arg0: i32) -> (i32, i32) {
    %c0_i32 = arith.constant 0 : i32
    %c0_i32_0 = arith.constant 0 : i32
    %c0_i32_1 = arith.constant 0 : i32
    return %c0_i32, %c0_i32_0 : i32, i32
  }
  func.func @transform_6(%arg0: i32) -> (i32, i32) {
    %c0_i32 = arith.constant 0 : i32
    %c0_i32_0 = arith.constant 0 : i32
    %c0_i32_1 = arith.constant 0 : i32
    return %c0_i32, %c0_i32_0 : i32, i32
  }
  func.func @transform_7(%arg0: i32) -> (i32, i32, i32) {
    %c0_i32 = arith.constant 0 : i32
    %c0_i32_0 = arith.constant 0 : i32
    %c0_i32_1 = arith.constant 0 : i32
    return %arg0, %c0_i32, %c0_i32_0 : i32, i32, i32
  }
}

</mosaic_0001>

<bundles_post_ra>
// kernel: bottleneck_forward.1
= control target key start
LH: loop header
LB: loop body
LE: loop exit
PB: predicated region body
PF: predicated region fallthrough
CT: control target
= control target key end

     0   :  { %s1477_s24 = smov 0   ;;  %s2145_s0 = inlined_call_operand.vmem [shape: f32[2,36,256], index: 0, kind: input, shape index: {}, may-alias: {0,7}]   ;;  %s2146_s1 = inlined_call_operand.vmem [shape: f32[24,1], index: 1, kind: input, shape index: {}]   ;;  %s2147_s2 = inlined_call_operand.vmem [shape: f32[24,1], index: 2, kind: input, shape index: {}]   ;;  %s2148_s3 = inlined_call_operand.vmem [shape: bf16[48,24], index: 3, kind: input, shape index: {}]   ;;  %s2149_s4 = inlined_call_operand.vmem [shape: f32[48,1], index: 4, kind: input, shape index: {}]   ;;  %s2150_s5 = inlined_call_operand.vmem [shape: f32[48,1], index: 5, kind: input, shape index: {}]   ;;  %s2151_s6 = inlined_call_operand.vmem [shape: bf16[12,432], index: 6, kind: input, shape index: {}]   ;;  %s2152_s7 = inlined_call_operand.vmem [shape: f32[2,36,256], index: 7, kind: output, shape index: {}, may-alias: {0,7}]  }
   0x1 LB: > { %s1356_s25 = sadd.s32 4294967295, %s1421_s24   ;;  %p1360_p0 = scmp.ge.s32.totalorder %s1421_s24, 1  ;;  %s1421_s24 = sphi %s1477_s24, %s17_s24  }
   0x2   : > { %p237_p1 = scmp.lt.s32.totalorder %s1421_s24, 3 }
   0x4   : > { %p238_p2 = pnand %p1360_p0, %p237_p1 }
   0x5   : > { %p269_p3 = scmp.lt.s32.totalorder (!%p238_p2), %s1356_s25, 1  ;;  %s1425_s26 = smov (!%p238_p2), 113  }
   0x6   : > { %241 = sbr.rel (%p238_p2) target bundleno = 953 (0x3b9), region = 48  ;;  %s1426_s27 = smov (!%p238_p2), 1  }
   0x7   : > { %s1427_s28 = smov (!%p238_p2), 15   ;;  %s1428_s29 = smov (!%p238_p2), 127  }
   0x8   : > { %s1429_s30 = smov (!%p238_p2), 17   ;;  %s1430_s8 = smov (!%p238_p2), 111  }
   0x9   : > { %s1431_s9 = smov (!%p238_p2), 95   ;;  %s1432_s16 = smov (!%p238_p2), 126  }
   0xa   : > { %s1433_s17 = smov (!%p238_p2), 112   ;;  %s1435_s19 = smov (!%p238_p2), 96  }
   0xb   : > { %v288_v0 = vld [vmem:[%s2146_s1 + $0x10] sm:$0xff]  ;;  %v286_v1 = vld [vmem:[%s2146_s1] sm:$0xff]  ;;  %v1423_v2 = vmov 0   ;;  %s2154_s25 = smov (!%p269_p3, %s1356_s25), 1  ;;  %v287_v4 = vld [vmem:[%s2146_s1 + $0x8] sm:$0xff]  ;;  %v559_v25 = vlaneseq  ;;  %v1424_v30 = vmov 0.0  }
   0xc   : > { %1405 = vset.pattern.permute.xlu1 %v1423_v2  ;;  %1404 = vset.pattern.permute.xlu0 %v1423_v2  ;;  %v312_v3 = vld [vmem:[%s2147_s2 + $0x10] sm:$0xff]  ;;  %s1381_s11 = smul.u32 80, %s2154_s25  ;;  %v310_v5 = vld [vmem:[%s2147_s2] sm:$0xff]  ;;  %v311_v6 = vld [vmem:[%s2147_s2 + $0x8] sm:$0xff]  ;;  %vm375_vm4 = vcmask 1043456   ;;  %vm365_vm5 = vcmask 195584  }
   0xd   : > { %301 = vperm.xlu0 %1404, %v288_v0   ;;  %291 = vperm.xlu1 %1405, %v286_v1   ;;  %v447_v13 = vld [vmem:[%s2149_s4 + $0x10] sm:$0xff]  ;;  %v448_v14 = vld [vmem:[%s2149_s4 + $0x18] sm:$0xff]  ;;  %v445_v17 = vld [vmem:[%s2149_s4] sm:$0xff]  ;;  %v560_v26 = vand.u32 127, %v559_v25  ;;  %s1436_s20 = smov 94   ;;  %vm626_vm6 = vcmask 924672  }
   0xe   : > { %414 = vmatprep.mubr.bf16.mxu0 %v1423_v2  ;;  %s273_s18 = scalar_lea.vmem %s2145_s0, %s1381_s11  ;;  %s1518_s21 = scalar_lea.vmem %s2152_s7, %s1381_s11  ;;  %v495_v15 = vld [vmem:[%s2150_s5 + $0x10] sm:$0xff]  ;;  %v496_v16 = vld [vmem:[%s2150_s5 + $0x18] sm:$0xff]  ;;  %v446_v18 = vld [vmem:[%s2149_s4 + $0x8] sm:$0xff]  ;;  %vm658_vm7 = vcmask 7168   ;;  %vm674_vm8 = vcmask 121856   ;;  %vm642_vm9 = vcmask 1039360  }
   0xf   : > { %v1509_v7 = vld [vmem:[%s273_s18 + $0x20] sm:$0xff]  ;;  %v1511_v8 = vld [vmem:[%s273_s18 + $0x28] sm:$0xff]  ;;  %v1522_v11 = vld [vmem:[%s273_s18 + $0x10] sm:$0xff]  ;;  %v566_v27 = vand.u32 15, %v560_v26  ;;  %v561_v28 = vadd.s32 128, %v560_v26  ;;  %vm690_vm10 = vcmask 138240  }
  0x10   : > { %v1513_v9 = vld [vmem:[%s273_s18] sm:$0xff]  ;;  %v1520_v10 = vld [vmem:[%s273_s18 + $0x8] sm:$0xff]  ;;  %v1524_v12 = vld [vmem:[%s273_s18 + $0x18] sm:$0xff]  ;;  %s1434_s18 = smov 110   ;;  %vm608_vm11 = vcmask 908288   ;;  %vm750_vm12 = vcmask 1031168  }
  0x11   : > { %325 = vperm.xlu0 %1404, %v312_v3   ;;  %296 = vperm.xlu1 %1405, %v287_v4   ;;  %1291 = vst [vmem:[%s1518_s21] sm:$0xff] %v1513_v9  ;;  %1292 = vst [vmem:[%s1518_s21 + $0x8] sm:$0xff] %v1520_v10  ;;  %v493_v19 = vld [vmem:[%s2150_s5] sm:$0xff]  ;;  %v494_v20 = vld [vmem:[%s2150_s5 + $0x8] sm:$0xff]  ;;  %vm594_vm0 = vcmp.lt.s32.totalorder %v566_v27, 15  ;;  %v573_v29 = vand.u32 15, %v561_v28  ;;  %vm586_vm2 = vcmp.gt.s32.totalorder %v566_v27, 0 }
  0x12   : > { %1293 = vst [vmem:[%s1518_s21 + $0x10] sm:$0xff] %v1522_v11  ;;  %1294 = vst [vmem:[%s1518_s21 + $0x18] sm:$0xff] %v1524_v12  ;;  %v449_v21 = vld [vmem:[%s2149_s4 + $0x20] sm:$0xff]  ;;  %v450_v22 = vld [vmem:[%s2149_s4 + $0x28] sm:$0xff]  ;;  %v1372_v31 = vsel %vm594_vm0, 1.0, %v1424_v30  ;;  %v1370_v35 = vsel %vm586_vm2, 1.0, %v1424_v30 }
  0x13   : > { %1295 = vst [vmem:[%s1518_s21 + $0x20] sm:$0xff] %v1509_v7  ;;  %1296 = vst [vmem:[%s1518_s21 + $0x28] sm:$0xff] %v1511_v8  ;;  %v497_v23 = vld [vmem:[%s2150_s5 + $0x20] sm:$0xff]  ;;  %v498_v24 = vld [vmem:[%s2150_s5 + $0x28] sm:$0xff]  ;;  %v600_v32 = vpack.c.bf16 %v1372_v31, %v1372_v31  ;;  %vm595_vm1 = vcmp.lt.s32.totalorder %v573_v29, 15  ;;  %vm587_vm3 = vcmp.gt.s32.totalorder %v573_v29, 0  ;;  %v592_v37 = vpack.c.bf16 %v1370_v35, %v1370_v35 }
  0x14   : > { %v1373_v33 = vsel %vm595_vm1, 1.0, %v1424_v30  ;;  %v1371_v36 = vsel %vm587_vm3, 1.0, %v1424_v30  ;;  %vm870_vm13 = vcmask 777216   ;;  %vm821_vm14 = vcmask 900096  }
  0x15   : > { %315 = vperm.xlu0 %1404, %v310_v5   ;;  %320 = vperm.xlu1 %1405, %v311_v6   ;;  %v601_v34 = vpack.c.bf16 %v1373_v33, %v1373_v33  ;;  %v593_v38 = vpack.c.bf16 %v1371_v36, %v1371_v36  ;;  %vm849_vm15 = vcmask 785408   ;;  %vm778_vm0 = vcmask 916480  }
  0x16   : > { %vm898_vm1 = vcmask 769024   ;;  %vm1201_vm2 = vcmask 392192  }
  0x19   : > { %463 = vperm.xlu0 %1404, %v447_v13   ;;  %468 = vperm.xlu1 %1405, %v448_v14   ;;  %v1408_v14 = vld [vmem:[%s2148_s3 + $0x10] sm:$0xff]  }
  0x1d   : > { %511 = vperm.xlu0 %1404, %v495_v15   ;;  %516 = vperm.xlu1 %1405, %v496_v16  }
  0x21   : > { %453 = vperm.xlu0 %1404, %v445_v17   ;;  %458 = vperm.xlu1 %1405, %v446_v18  }
  0x25   : > { %501 = vperm.xlu0 %1404, %v493_v19   ;;  %506 = vperm.xlu1 %1405, %v494_v20  }
  0x29   : > { %473 = vperm.xlu0 %1404, %v449_v21   ;;  %478 = vperm.xlu1 %1405, %v450_v22  }
  0x2d   : > { %521 = vperm.xlu0 %1404, %v497_v23   ;;  %526 = vperm.xlu1 %1405, %v498_v24  }
  0x31   : > { %622 = vrot.lane.b32.xlu0 %v600_v32, %s1425_s26  ;;  %624 = vrot.lane.b32.xlu1 %v601_v34, %s1425_s26 }
  0x35   : > { %654 = vrot.lane.b32.xlu0 %v600_v32, %s1426_s27  ;;  %656 = vrot.lane.b32.xlu1 %v601_v34, %s1426_s27 }
  0x39   : > { %670 = vrot.lane.b32.xlu0 %v592_v37, %s1427_s28  ;;  %672 = vrot.lane.b32.xlu1 %v593_v38, %s1427_s28 }
  0x3d   : > { %638 = vrot.lane.b32.xlu0 %v592_v37, %s1428_s29  ;;  %640 = vrot.lane.b32.xlu1 %v593_v38, %s1428_s29 }
  0x41   : > { %686 = vrot.lane.b32.xlu0 %v600_v32, %s1429_s30  ;;  %688 = vrot.lane.b32.xlu1 %v601_v34, %s1429_s30 }
  0x45   : > { %604 = vrot.lane.b32.xlu0 %v592_v37, %s1430_s8  ;;  %709 = vrot.lane.b32.xlu1 %v1423_v2, %s1428_s29 }
  0x49   : > { %860 = vrot.lane.b32.xlu0 %v1423_v2, %s1431_s9  ;;  %606 = vrot.lane.b32.xlu1 %v593_v38, %s1430_s8 }
  0x88   : > { %v302_v39 = vpop.permute.xlu0 %301  ;;  %v292_v40 = vpop.permute.xlu1 %291 }
  0x89   : > { %v308_v41 = vmul.f32 %v302_v39, %v1509_v7  ;;  %v309_v42 = vmul.f32 %v302_v39, %v1511_v8  ;;  %v304_v47 = vmul.f32 %v292_v40, %v1513_v9  ;;  %v305_v48 = vmul.f32 %v292_v40, %v1520_v10  ;;  %v1406_v7 = vld [vmem:[%s2148_s3] sm:$0xff]   ;;  %v1407_v10 = vld [vmem:[%s2148_s3 + $0x8] sm:$0xff]  }
  0x8c   : > { %v326_v43 = vpop.permute.xlu0 %325  ;;  %v297_v44 = vpop.permute.xlu1 %296 }
  0x8d   : > { %v333_v45 = vadd.f32 %v326_v43, %v309_v42  ;;  %v332_v46 = vadd.f32 %v326_v43, %v308_v41  ;;  %v306_v49 = vmul.f32 %v297_v44, %v1522_v11  ;;  %v307_v50 = vmul.f32 %v297_v44, %v1524_v12 }
  0x8f   : > { %v339_v51 = vmax.f32 %v333_v45, 0.0  ;;  %v338_v52 = vmax.f32 %v332_v46, 0.0 }
  0x90   : > { %v316_v53 = vpop.permute.xlu0 %315  ;;  %v321_v54 = vpop.permute.xlu1 %320 }
  0x91   : > { %v328_v55 = vadd.f32 %v316_v53, %v304_v47  ;;  %v329_v56 = vadd.f32 %v316_v53, %v305_v48  ;;  %v330_v57 = vadd.f32 %v321_v54, %v306_v49  ;;  %v331_v58 = vadd.f32 %v321_v54, %v307_v50 }
  0x92   : > { %v349_v59 = vpack.c.bf16 %v339_v51, %v339_v51  ;;  %v348_v60 = vpack.c.bf16 %v338_v52, %v338_v52 }
  0x93   : > { %v334_v61 = vmax.f32 %v328_v55, 0.0  ;;  %v335_v62 = vmax.f32 %v329_v56, 0.0  ;;  %v336_v63 = vmax.f32 %v330_v57, 0.0  ;;  %v337_v0 = vmax.f32 %v331_v58, 0.0 }
  0x94   : > { %1366 = vmatprep.subr.msk.bf16.mxu0 %vm375_vm4, %v349_v59  ;;  %v1590_v1 = vpop.permute.xlu0 %463  ;;  %v377_v3 = vsel %vm375_vm4, %v348_v60, 0  ;;  %v1604_v12 = vpop.permute.xlu1 %468 }
  0x95   : > { %395 = vmatpush1.bf16.msra.mxu0 %v377_v3  ;;  %v347_v4 = vpack.c.bf16 %v337_v0, %v335_v62  ;;  %v346_v5 = vpack.c.bf16 %v336_v63, %v334_v61 }
  0x97   : > { %396 = vmatprep.subr.bf16.mxu0 %v347_v4 }
  0x98   : > { %v1592_v6 = vpop.permute.xlu0 %511  ;;  %v1611_v15 = vpop.permute.xlu1 %516 }
  0x99   : > { %397 = vmatpush1.bf16.msra.mxu0 %v346_v5 }
  0x9c   : > { %1367 = vmatmul.mubr.msk.bf16.vlgmr.msra.gmra.mxu0 %vm365_vm5, %v1406_v7  ;;  %v454_v8 = vpop.permute.xlu0 %453  ;;  %v459_v19 = vpop.permute.xlu1 %458 }
  0x9d   : > { %424 = vmatprep.mubr.bf16.mxu0 %v1423_v2 }
  0xa0   : > { %v502_v9 = vpop.permute.xlu0 %501  ;;  %v507_v20 = vpop.permute.xlu1 %506 }
  0xa4   : > { %1368 = vmatmul.mubr.msk.bf16.gmra.mxu0 %vm365_vm5, %v1407_v10  ;;  %v1601_v11 = vpop.permute.xlu0 %473  ;;  %v1622_v23 = vpop.permute.xlu1 %478 }
  0xa5   : > { %434 = vmatprep.mubr.bf16.mxu0 %v1423_v2 }
  0xa8   : > { %v1606_v13 = vpop.permute.xlu0 %521  ;;  %v1628_v26 = vpop.permute.xlu1 %526 }
  0xac   : > { %1369 = vmatmul.mubr.msk.bf16.gmra.mxu0 %vm365_vm5, %v1408_v14  ;;  %v623_v16 = vpop.permute.xlu0 %622  ;;  %v1630_v27 = vpop.permute.xlu1 %624 }
  0xad   : > { %v631_v17 = vmul.bf16 0, %v623_v16  ;;  %v1647_v54 = vsel %vm626_vm6, %v623_v16, %v1630_v27 }
  0xaf   : > { %736 = vrot.lane.b32.xlu0 %v631_v17, %s1432_s16 }
  0xb0   : > { %v1614_v18 = vpop.permute.xlu0 %654  ;;  %v657_v28 = vpop.permute.xlu1 %656 }
  0xb1   : > { %v665_v32 = vmul.bf16 0, %v657_v28  ;;  %v1656_v58 = vsel %vm658_vm7, %v1614_v18, %v657_v28 }
  0xb4   : > { %v1616_v2 = vpop.permute.xlu0 %670  ;;  %v673_v29 = vpop.permute.xlu1 %672 }
  0xb5   : > { %v681_v33 = vmul.bf16 0, %v673_v29  ;;  %v1663_v62 = vsel %vm674_vm8, %v1616_v2, %v673_v29 }
  0xb8   : > { %v1618_v21 = vpop.permute.xlu0 %638  ;;  %v1633_v31 = vpop.permute.xlu1 %640 }
  0xb9   : > { %v647_v30 = vmul.bf16 0, %v1618_v21  ;;  %v1674_v5 = vsel %vm642_vm9, %v1618_v21, %v1633_v31 }
  0xbb   : > { %764 = vrot.lane.b32.xlu1 %v647_v30, %s1433_s17 }
  0xbc   : > { %v1620_v22 = vpop.permute.xlu0 %686  ;;  %v1636_v34 = vpop.permute.xlu1 %688 }
  0xbd   : > { %v697_v35 = vmul.bf16 0, %v1636_v34  ;;  %v1685_v14 = vsel %vm690_vm10, %v1620_v22, %v1636_v34 }
  0xbf   : > { %811 = vrot.lane.b32.xlu1 %v665_v32, %s1434_s18 }
  0xc0   : > { %v1624_v24 = vpop.permute.xlu0 %604  ;;  %v1667_v4 = vpop.permute.xlu1 %709 }
  0xc1   : > { %v613_v25 = vmul.bf16 0, %v1624_v24 }
  0xc3   : > { %935 = vrot.lane.b32.xlu0 %v613_v25, %s1429_s30 }
  0xc4   : > { %v1687_v16 = vpop.permute.xlu1 %606 }
  0xc5   : > { %v1698_v28 = vsel %vm608_vm11, %v1624_v24, %v1687_v16 }
  0xc7   : > { %839 = vrot.lane.b32.xlu0 %v681_v33, %s1435_s19 }
  0xcb   : > { %888 = vrot.lane.b32.xlu0 %v697_v35, %s1436_s20 }
 0x15c   : > { %v416_v36 = vpop.f32.mrf.mxu0 }
 0x15d   : > { %v481_v37 = vmul.f32 %v454_v8, %v416_v36 }
 0x15e   : > { %v418_v38 = vpop.f32.mrf.mxu0 }
 0x15f   : > { %v529_v40 = vadd.f32 %v502_v9, %v481_v37  ;;  %v482_v41 = vmul.f32 %v454_v8, %v418_v38 }
 0x160   : > { %v420_v39 = vpop.f32.mrf.mxu0 }
 0x161   : > { %v483_v42 = vmul.f32 %v459_v19, %v420_v39  ;;  %v541_v46 = vmax.f32 %v529_v40, 0.0  ;;  %v530_v47 = vadd.f32 %v502_v9, %v482_v41 }
 0x162   : > { %v422_v43 = vpop.f32.mrf.mxu0 }
 0x163   : > { %v531_v44 = vadd.f32 %v507_v20, %v483_v42  ;;  %v484_v45 = vmul.f32 %v459_v19, %v422_v43  ;;  %v542_v52 = vmax.f32 %v530_v47, 0.0 }
 0x164   : > { %v426_v57 = vpop.f32.mrf.mxu0 }
 0x165   : > { %v543_v48 = vmax.f32 %v531_v44, 0.0  ;;  %v532_v49 = vadd.f32 %v507_v20, %v484_v45  ;;  %v485_v10 = vmul.f32 %v1590_v1, %v426_v57 }
 0x166   : > { %v428_v61 = vpop.f32.mrf.mxu0 }
 0x167   : > { %v553_v50 = vpack.c.bf16 %v543_v48, %v541_v46  ;;  %v544_v51 = vmax.f32 %v532_v49, 0.0  ;;  %v533_v25 = vadd.f32 %v1592_v6, %v485_v10  ;;  %v486_v35 = vmul.f32 %v1590_v1, %v428_v61 }
 0x168   : > { %v430_v3 = vpop.f32.mrf.mxu0 }
 0x169   : > { %856 = vrot.lane.b32.xlu1 %v553_v50, %s1431_s9  ;;  %711 = vrot.lane.b32.xlu0 %v553_v50, %s1428_s29  ;;  %v554_v53 = vpack.c.bf16 %v544_v51, %v542_v52  ;;  %v632_v55 = vmul.bf16 %v1647_v54, %v553_v50  ;;  %v663_v59 = vmul.bf16 %v1614_v18, %v553_v50  ;;  %v545_v34 = vmax.f32 %v533_v25, 0.0 }
 0x16a   : > { %v679_v63 = vmul.bf16 %v1616_v2, %v553_v50  ;;  %v487_v7 = vmul.f32 %v1604_v12, %v430_v3  ;;  %v648_v8 = vmul.bf16 %v1674_v5, %v553_v50  ;;  %v695_v19 = vmul.bf16 %v1620_v22, %v553_v50  ;;  %v432_v21 = vpop.f32.mrf.mxu0 }
 0x16b   : > { %v633_v56 = vmul.bf16 %v1630_v27, %v554_v53  ;;  %v664_v60 = vmul.bf16 %v1656_v58, %v554_v53  ;;  %v680_v0 = vmul.bf16 %v1663_v62, %v554_v53  ;;  %v649_v9 = vmul.bf16 %v1633_v31, %v554_v53 }
 0x16c   : > { %v535_v17 = vadd.f32 %v1611_v15, %v487_v7  ;;  %v696_v20 = vmul.bf16 %v1685_v14, %v554_v53  ;;  %v488_v30 = vmul.f32 %v1604_v12, %v432_v21  ;;  %v614_v32 = vmul.bf16 %v1698_v28, %v553_v50  ;;  %v436_v40 = vpop.f32.mrf.mxu0 }
 0x16d   : > { %785 = vrot.lane.b32.xlu1 %v553_v50, %s1430_s8  ;;  %858 = vrot.lane.b32.xlu0 %v554_v53, %s1431_s9  ;;  %v615_v33 = vmul.bf16 %v1687_v16, %v554_v53  ;;  %v534_v24 = vadd.f32 %v1592_v6, %v486_v35  ;;  %v489_v51 = vmul.f32 %v1601_v11, %v436_v40 }
 0x16e   : > { %v547_v29 = vmax.f32 %v535_v17, 0.0  ;;  %v536_v37 = vadd.f32 %v1611_v15, %v488_v30  ;;  %v438_v15 = vpop.f32.mrf.mxu0 }
 0x16f   : > { %v546_v39 = vmax.f32 %v534_v24, 0.0  ;;  %v490_v52 = vmul.f32 %v1601_v11, %v438_v15  ;;  %v537_v57 = vadd.f32 %v1606_v13, %v489_v51 }
 0x170   : > { %v555_v36 = vpack.c.bf16 %v547_v29, %v545_v34  ;;  %v548_v12 = vmax.f32 %v536_v37, 0.0  ;;  %v440_v43 = vpop.f32.mrf.mxu0 }
 0x171   : > { %738 = vrot.lane.b32.xlu1 %v632_v55, %s1432_s16  ;;  %787 = vrot.lane.b32.xlu0 %v554_v53, %s1430_s8  ;;  %v491_v47 = vmul.f32 %v1622_v23, %v440_v43 }
 0x172   : > { %v634_v38 = vmul.bf16 %v1647_v54, %v555_v36  ;;  %v556_v1 = vpack.c.bf16 %v548_v12, %v546_v39  ;;  %v682_v6 = vmul.bf16 %v1616_v2, %v555_v36  ;;  %v650_v41 = vmul.bf16 %v1674_v5, %v555_v36  ;;  %v442_v46 = vpop.f32.mrf.mxu0 }
 0x173   : > { %v666_v42 = vmul.bf16 %v1614_v18, %v555_v36  ;;  %v616_v44 = vmul.bf16 %v1698_v28, %v555_v36  ;;  %v698_v45 = vmul.bf16 %v1620_v22, %v555_v36  ;;  %v492_v48 = vmul.f32 %v1622_v23, %v442_v46 }
 0x174   : > { %v683_v49 = vmul.bf16 %v1663_v62, %v556_v1  ;;  %v635_v50 = vmul.bf16 %v1630_v27, %v556_v1  ;;  %v651_v23 = vmul.bf16 %v1633_v31, %v556_v1  ;;  %v699_v61 = vmul.bf16 %v1685_v14, %v556_v1 }
 0x175   : > { %713 = vrot.lane.b32.xlu1 %v554_v53, %s1428_s29  ;;  %740 = vrot.lane.b32.xlu0 %v633_v56, %s1432_s16  ;;  %v539_v53 = vadd.f32 %v1628_v26, %v491_v47  ;;  %v540_v55 = vadd.f32 %v1628_v26, %v492_v48  ;;  %v667_v56 = vmul.bf16 %v1656_v58, %v556_v1 }
 0x177   : > { %v551_v11 = vmax.f32 %v539_v53, 0.0 }
 0x179   : > { %807 = vrot.lane.b32.xlu1 %v663_v59, %s1434_s18  ;;  %809 = vrot.lane.b32.xlu0 %v664_v60, %s1434_s18  ;;  %v538_v59 = vadd.f32 %v1606_v13, %v490_v52  ;;  %v552_v60 = vmax.f32 %v540_v55, 0.0 }
 0x17b   : > { %v550_v26 = vmax.f32 %v538_v59, 0.0 }
 0x17d   : > { %835 = vrot.lane.b32.xlu1 %v679_v63, %s1435_s19  ;;  %837 = vrot.lane.b32.xlu0 %v680_v0, %s1435_s19  ;;  %v617_v63 = vmul.bf16 %v1687_v16, %v556_v1  ;;  %v549_v0 = vmax.f32 %v537_v57, 0.0  ;;  %v558_v7 = vpack.c.bf16 %v552_v60, %v550_v26 }
 0x17f   : > { %v557_v3 = vpack.c.bf16 %v551_v11, %v549_v0  ;;  %v685_v17 = vmul.bf16 %v1663_v62, %v558_v7  ;;  %v637_v25 = vmul.bf16 %v1630_v27, %v558_v7 }
 0x181   : > { %766 = vrot.lane.b32.xlu1 %v648_v8, %s1433_s17  ;;  %768 = vrot.lane.b32.xlu0 %v649_v9, %s1433_s17  ;;  %v684_v13 = vmul.bf16 %v1616_v2, %v557_v3  ;;  %v618_v8 = vmul.bf16 %v1698_v28, %v557_v3  ;;  %v1756_v9 = vpop.permute.xlu0 %860  ;;  %v668_v10 = vmul.bf16 %v1614_v18, %v557_v3 }
 0x182   : > { %v669_v2 = vmul.bf16 %v1656_v58, %v558_v7  ;;  %v700_v21 = vmul.bf16 %v1620_v22, %v557_v3  ;;  %v653_v18 = vmul.bf16 %v1633_v31, %v558_v7  ;;  %v701_v58 = vmul.bf16 %v1685_v14, %v558_v7  ;;  %v1782_v31 = vpop.permute.xlu1 %764 }
 0x183   : > { %v619_v22 = vmul.bf16 %v1687_v16, %v558_v7 }
 0x185   : > { %884 = vrot.lane.b32.xlu1 %v695_v19, %s1436_s20  ;;  %886 = vrot.lane.b32.xlu0 %v696_v20, %s1436_s20  ;;  %v652_v19 = vmul.bf16 %v1674_v5, %v557_v3  ;;  %v1764_v20 = vpop.permute.xlu0 %736  ;;  %v636_v5 = vmul.bf16 %v1647_v54, %v557_v3 }
 0x186   : > { %v1788_v54 = vpop.permute.xlu1 %811 }
 0x189   : > { %937 = vrot.lane.b32.xlu1 %v614_v32, %s1429_s30  ;;  %939 = vrot.lane.b32.xlu0 %v615_v33, %s1429_s30  ;;  %v1772_v62 = vpop.permute.xlu0 %935 }
 0x18d   : > { %862 = vrot.lane.b32.xlu1 %v555_v36, %s1431_s9  ;;  %715 = vrot.lane.b32.xlu0 %v555_v36, %s1428_s29  ;;  %v1780_v28 = vpop.permute.xlu0 %839 }
 0x191   : > { %789 = vrot.lane.b32.xlu1 %v555_v36, %s1430_s8  ;;  %742 = vrot.lane.b32.xlu0 %v634_v38, %s1432_s16  ;;  %v1786_v29 = vpop.permute.xlu0 %888 }
 0x195   : > { %864 = vrot.lane.b32.xlu0 %v556_v1, %s1431_s9  ;;  %717 = vrot.lane.b32.xlu1 %v556_v1, %s1428_s29 }
 0x199   : > { %791 = vrot.lane.b32.xlu0 %v556_v1, %s1430_s8  ;;  %841 = vrot.lane.b32.xlu1 %v682_v6, %s1435_s19 }
 0x19d   : > { %770 = vrot.lane.b32.xlu0 %v650_v41, %s1433_s17  ;;  %813 = vrot.lane.b32.xlu1 %v666_v42, %s1434_s18 }
 0x1a1   : > { %941 = vrot.lane.b32.xlu0 %v616_v44, %s1429_s30  ;;  %890 = vrot.lane.b32.xlu1 %v698_v45, %s1436_s20 }
 0x1a5   : > { %843 = vrot.lane.b32.xlu0 %v683_v49, %s1435_s19  ;;  %744 = vrot.lane.b32.xlu1 %v635_v50, %s1432_s16 }
 0x1a9   : > { %815 = vrot.lane.b32.xlu0 %v667_v56, %s1434_s18  ;;  %772 = vrot.lane.b32.xlu1 %v651_v23, %s1433_s17 }
 0x1ad   : > { %892 = vrot.lane.b32.xlu0 %v699_v61, %s1436_s20  ;;  %943 = vrot.lane.b32.xlu1 %v617_v63, %s1429_s30 }
 0x1b1   : > { %719 = vrot.lane.b32.xlu1 %v557_v3, %s1428_s29  ;;  %721 = vrot.lane.b32.xlu0 %v558_v7, %s1428_s29 }
 0x1b5   : > { %866 = vrot.lane.b32.xlu1 %v557_v3, %s1431_s9  ;;  %868 = vrot.lane.b32.xlu0 %v558_v7, %s1431_s9 }
 0x1b9   : > { %793 = vrot.lane.b32.xlu1 %v557_v3, %s1430_s8  ;;  %795 = vrot.lane.b32.xlu0 %v558_v7, %s1430_s8 }
 0x1bd   : > { %845 = vrot.lane.b32.xlu1 %v684_v13, %s1435_s19  ;;  %945 = vrot.lane.b32.xlu0 %v618_v8, %s1429_s30 }
 0x1c1   : > { %817 = vrot.lane.b32.xlu1 %v668_v10, %s1434_s18  ;;  %847 = vrot.lane.b32.xlu0 %v685_v17, %s1435_s19 }
 0x1c5   : > { %774 = vrot.lane.b32.xlu1 %v652_v19, %s1433_s17  ;;  %819 = vrot.lane.b32.xlu0 %v669_v2, %s1434_s18 }
 0x1c9   : > { %894 = vrot.lane.b32.xlu1 %v700_v21, %s1436_s20  ;;  %776 = vrot.lane.b32.xlu0 %v653_v18, %s1433_s17 }
 0x1cd   : > { %746 = vrot.lane.b32.xlu1 %v636_v5, %s1432_s16  ;;  %896 = vrot.lane.b32.xlu0 %v701_v58, %s1436_s20 }
 0x1d1   : > { %748 = vrot.lane.b32.xlu0 %v637_v25, %s1432_s16  ;;  %947 = vrot.lane.b32.xlu1 %v619_v22, %s1429_s30 }
 0x1db   : > { %v857_v14 = vpop.permute.xlu1 %856  ;;  %v712_v30 = vpop.permute.xlu0 %711 }
 0x1dc   : > { %1057 = vrot.lane.b32.xlu1 %v857_v14, %s1429_s30  ;;  %v723_v16 = vsel %vm642_vm9, %v1667_v4, %v712_v30 }
 0x1df   : > { %v786_v32 = vpop.permute.xlu1 %785  ;;  %v859_v27 = vpop.permute.xlu0 %858 }
 0x1e0   : > { %1003 = vrot.lane.b32.xlu0 %v786_v32, %s1429_s30  ;;  %949 = vrot.lane.b32.xlu1 %v723_v16, %s1429_s30  ;;  %v872_v6 = vsel %vm870_vm13, %v859_v27, %v1756_v9  ;;  %v871_v47 = vsel %vm870_vm13, %v857_v14, %v859_v27 }
 0x1e3   : > { %v739_v33 = vpop.permute.xlu1 %738  ;;  %v788_v34 = vpop.permute.xlu0 %787 }
 0x1e4   : > { %v751_v39 = vsel %vm750_vm12, %v1764_v20, %v739_v33  ;;  %v797_v42 = vsel %vm608_vm11, %v786_v32, %v788_v34 }
 0x1e7   : > { %v714_v35 = vpop.permute.xlu1 %713  ;;  %v741_v36 = vpop.permute.xlu0 %740 }
 0x1e8   : > { %953 = vrot.lane.b32.xlu0 %v714_v35, %s1429_s30  ;;  %v724_v43 = vsel %vm642_vm9, %v712_v30, %v714_v35  ;;  %v752_v46 = vsel %vm750_vm12, %v739_v33, %v741_v36 }
 0x1eb   : > { %v808_v37 = vpop.permute.xlu1 %807  ;;  %v810_v24 = vpop.permute.xlu0 %809 }
 0x1ec   : > { %1021 = vrot.lane.b32.xlu0 %v808_v37, %s1429_s30  ;;  %v822_v50 = vsel %vm821_vm14, %v808_v37, %v810_v24  ;;  %v823_v55 = vsel %vm821_vm14, %v810_v24, %v1788_v54 }
 0x1ef   : > { %v836_v12 = vpop.permute.xlu1 %835  ;;  %v838_v38 = vpop.permute.xlu0 %837 }
 0x1f0   : > { %967 = vrot.lane.b32.xlu0 %v751_v39, %s1429_s30  ;;  %1039 = vrot.lane.b32.xlu1 %v836_v12, %s1429_s30  ;;  %v850_v53 = vsel %vm849_vm15, %v836_v12, %v838_v38  ;;  %v851_v57 = vsel %vm849_vm15, %v838_v38, %v1780_v28 }
 0x1f3   : > { %v1801_v1 = vpop.permute.xlu1 %766  ;;  %v1803_v40 = vpop.permute.xlu0 %768 }
 0x1f4   : > { %1061 = vrot.lane.b32.xlu0 %v872_v6, %s1429_s30  ;;  %1007 = vrot.lane.b32.xlu1 %v788_v34, %s1429_s30 }
 0x1f7   : > { %v1809_v15 = vpop.permute.xlu1 %884  ;;  %v1811_v41 = vpop.permute.xlu0 %886 }
 0x1f8   : > { %1005 = vrot.lane.b32.xlu0 %v797_v42, %s1429_s30  ;;  %951 = vrot.lane.b32.xlu1 %v724_v43, %s1429_s30 }
 0x1fb   : > { %v1817_v44 = vpop.permute.xlu1 %937  ;;  %v1819_v45 = vpop.permute.xlu0 %939 }
 0x1fc   : > { %969 = vrot.lane.b32.xlu0 %v752_v46, %s1429_s30  ;;  %1059 = vrot.lane.b32.xlu1 %v871_v47, %s1429_s30 }
 0x1ff   : > { %v863_v48 = vpop.permute.xlu1 %862  ;;  %v716_v49 = vpop.permute.xlu0 %715 }
 0x200   : > { %1023 = vrot.lane.b32.xlu0 %v822_v50, %s1429_s30  ;;  %971 = vrot.lane.b32.xlu1 %v741_v36, %s1429_s30  ;;  %v725_v63 = vsel %vm642_vm9, %v1667_v4, %v716_v49 }
 0x203   : > { %v790_v51 = vpop.permute.xlu1 %789  ;;  %v743_v52 = vpop.permute.xlu0 %742 }
 0x204   : > { %1041 = vrot.lane.b32.xlu0 %v850_v53, %s1429_s30  ;;  %1025 = vrot.lane.b32.xlu1 %v823_v55, %s1429_s30  ;;  %v753_v10 = vsel %vm750_vm12, %v1764_v20, %v743_v52 }
 0x207   : > { %v865_v56 = vpop.permute.xlu0 %864  ;;  %v718_v23 = vpop.permute.xlu1 %717 }
 0x208   : > { %1063 = vrot.lane.b32.xlu0 %v863_v48, %s1429_s30  ;;  %1043 = vrot.lane.b32.xlu1 %v851_v57, %s1429_s30  ;;  %v726_v3 = vsel %vm642_vm9, %v716_v49, %v718_v23  ;;  %v873_v8 = vsel %vm870_vm13, %v863_v48, %v865_v56  ;;  %v874_v21 = vsel %vm870_vm13, %v865_v56, %v1756_v9 }
 0x209   : > { %v780_v49 = vsel %vm778_vm0, %v1801_v1, %v1803_v40 }
 0x20b   : > { %v792_v59 = vpop.permute.xlu0 %791  ;;  %v842_v11 = vpop.permute.xlu1 %841 }
 0x20c   : > { %1009 = vrot.lane.b32.xlu0 %v790_v51, %s1429_s30  ;;  %959 = vrot.lane.b32.xlu1 %v718_v23, %s1429_s30  ;;  %v798_v2 = vsel %vm608_vm11, %v790_v51, %v792_v59 }
 0x20f   : > { %v771_v60 = vpop.permute.xlu0 %770  ;;  %v1839_v61 = vpop.permute.xlu1 %813 }
 0x210   : > { %955 = vrot.lane.b32.xlu0 %v725_v63, %s1429_s30  ;;  %1045 = vrot.lane.b32.xlu1 %v842_v11, %s1429_s30  ;;  %v781_v6 = vsel %vm778_vm0, %v1782_v31, %v771_v60 }
 0x213   : > { %v1845_v0 = vpop.permute.xlu0 %941  ;;  %v1847_v26 = vpop.permute.xlu1 %890 }
 0x214   : > { %957 = vrot.lane.b32.xlu0 %v726_v3, %s1429_s30  ;;  %1013 = vrot.lane.b32.xlu1 %v792_v59, %s1429_s30 }
 0x217   : > { %v844_v7 = vpop.permute.xlu0 %843  ;;  %v745_v13 = vpop.permute.xlu1 %744 }
 0x218   : > { %1065 = vrot.lane.b32.xlu0 %v873_v8, %s1429_s30  ;;  %973 = vrot.lane.b32.xlu1 %v753_v10, %s1429_s30  ;;  %v754_v18 = vsel %vm750_vm12, %v743_v52, %v745_v13  ;;  %v852_v22 = vsel %vm849_vm15, %v842_v11, %v844_v7  ;;  %v853_v14 = vsel %vm849_vm15, %v844_v7, %v1780_v28 }
 0x21b   : > { %v816_v17 = vpop.permute.xlu0 %815  ;;  %v773_v19 = vpop.permute.xlu1 %772 }
 0x21c   : > { %1011 = vrot.lane.b32.xlu0 %v798_v2, %s1429_s30  ;;  %1067 = vrot.lane.b32.xlu1 %v874_v21, %s1429_s30  ;;  %v824_v27 = vsel %vm821_vm14, %v1839_v61, %v816_v17  ;;  %v825_v16 = vsel %vm821_vm14, %v816_v17, %v1788_v54  ;;  %v782_v12 = vsel %vm778_vm0, %v771_v60, %v773_v19 }
 0x21f   : > { %v1863_v5 = vpop.permute.xlu0 %892  ;;  %v944_v58 = vpop.permute.xlu1 %943 }
 0x220   : > { %977 = vrot.lane.b32.xlu0 %v745_v13, %s1429_s30  ;;  %975 = vrot.lane.b32.xlu1 %v754_v18, %s1429_s30  ;;  %v1869_v25 = vsel %vm690_vm10, %v1845_v0, %v944_v58  ;;  %v901_v11 = vsel %vm898_vm1, %v1847_v26, %v1863_v5 }
 0x223   : > { %v720_v30 = vpop.permute.xlu1 %719  ;;  %v722_v32 = vpop.permute.xlu0 %721 }
 0x224   : > { %1047 = vrot.lane.b32.xlu0 %v852_v22, %s1429_s30  ;;  %1049 = vrot.lane.b32.xlu1 %v853_v14, %s1429_s30  ;;  %v727_v37 = vsel %vm642_vm9, %v1667_v4, %v720_v30  ;;  %v728_v47 = vsel %vm642_vm9, %v720_v30, %v722_v32 }
 0x227   : > { %v867_v33 = vpop.permute.xlu1 %866  ;;  %v869_v34 = vpop.permute.xlu0 %868 }
 0x228   : > { %1029 = vrot.lane.b32.xlu0 %v824_v27, %s1429_s30  ;;  %1031 = vrot.lane.b32.xlu1 %v825_v16, %s1429_s30  ;;  %v875_v43 = vsel %vm870_vm13, %v867_v33, %v869_v34  ;;  %v876_v23 = vsel %vm870_vm13, %v869_v34, %v1756_v9  ;;  %v779_v9 = vsel %vm778_vm0, %v1782_v31, %v1801_v1 }
 0x22b   : > { %v794_v35 = vpop.permute.xlu1 %793  ;;  %v796_v36 = vpop.permute.xlu0 %795 }
 0x22c   : > { %1015 = vrot.lane.b32.xlu0 %v794_v35, %s1429_s30  ;;  %1069 = vrot.lane.b32.xlu1 %v867_v33, %s1429_s30  ;;  %v799_v51 = vsel %vm608_vm11, %v794_v35, %v796_v36 }
 0x22f   : > { %v846_v24 = vpop.permute.xlu1 %845  ;;  %v1889_v39 = vpop.permute.xlu0 %945 }
 0x230   : > { %965 = vrot.lane.b32.xlu0 %v722_v32, %s1429_s30  ;;  %961 = vrot.lane.b32.xlu1 %v727_v37, %s1429_s30 }
 0x233   : > { %v818_v38 = vpop.permute.xlu1 %817  ;;  %v848_v4 = vpop.permute.xlu0 %847 }
 0x234   : > { %993 = vrot.lane.b32.xlu0 %v782_v12, %s1429_s30  ;;  %1051 = vrot.lane.b32.xlu1 %v846_v24, %s1429_s30  ;;  %v854_v57 = vsel %vm849_vm15, %v846_v24, %v848_v4  ;;  %v855_v63 = vsel %vm849_vm15, %v848_v4, %v1780_v28  ;;  %v902_v28 = vsel %vm898_vm1, %v1863_v5, %v1786_v29 }
 0x235   : > { %v900_v12 = vsel %vm898_vm1, %v1811_v41, %v1786_v29 }
 0x237   : > { %v775_v42 = vpop.permute.xlu1 %774  ;;  %v820_v50 = vpop.permute.xlu0 %819 }
 0x238   : > { %991 = vrot.lane.b32.xlu0 %v781_v6, %s1429_s30  ;;  %1019 = vrot.lane.b32.xlu1 %v796_v36, %s1429_s30  ;;  %v783_v56 = vsel %vm778_vm0, %v1782_v31, %v775_v42  ;;  %v826_v3 = vsel %vm821_vm14, %v818_v38, %v820_v50  ;;  %v827_v2 = vsel %vm821_vm14, %v820_v50, %v1788_v54 }
 0x23b   : > { %v895_v46 = vpop.permute.xlu1 %894  ;;  %v777_v55 = vpop.permute.xlu0 %776 }
 0x23c   : > { %1071 = vrot.lane.b32.xlu0 %v875_v43, %s1429_s30  ;;  %1033 = vrot.lane.b32.xlu1 %v818_v38, %s1429_s30  ;;  %v784_v8 = vsel %vm778_vm0, %v775_v42, %v777_v55 }
 0x23f   : > { %v747_v48 = vpop.permute.xlu1 %746  ;;  %v897_v59 = vpop.permute.xlu0 %896 }
 0x240   : > { %987 = vrot.lane.b32.xlu0 %v780_v49, %s1429_s30  ;;  %963 = vrot.lane.b32.xlu1 %v728_v47, %s1429_s30  ;;  %v903_v10 = vsel %vm898_vm1, %v895_v46, %v897_v59  ;;  %v755_v54 = vsel %vm750_vm12, %v1764_v20, %v747_v48  ;;  %v904_v58 = vsel %vm898_vm1, %v897_v59, %v1786_v29  ;;  %v1411_v20 = vld [vmem:[%s2151_s6 + $0x4] ss:$16 sps:$4 sm:$0x3f]  }
 0x241   : > { %1237 = vmatprep.mubr.bf16.mxu1 %v1411_v20 }
 0x243   : > { %v948_v52 = vpop.permute.xlu1 %947  ;;  %v749_v60 = vpop.permute.xlu0 %748 }
 0x244   : > { %1017 = vrot.lane.b32.xlu0 %v799_v51, %s1429_s30  ;;  %1027 = vrot.lane.b32.xlu1 %v1839_v61, %s1429_s30  ;;  %v1912_v53 = vsel %vm690_vm10, %v1889_v39, %v948_v52  ;;  %v756_v5 = vsel %vm750_vm12, %v747_v48, %v749_v60 }
 0x248   : > { %997 = vrot.lane.b32.xlu0 %v783_v56, %s1429_s30  ;;  %995 = vrot.lane.b32.xlu1 %v773_v19, %s1429_s30 }
 0x24c   : > { %1053 = vrot.lane.b32.xlu0 %v854_v57, %s1429_s30  ;;  %1073 = vrot.lane.b32.xlu1 %v876_v23, %s1429_s30 }
 0x24e   : > { %v1058_v7 = vpop.permute.xlu1 %1057 }
 0x250   : > { %1083 = vrot.lane.b32.xlu0 %v901_v11, %s1429_s30  ;;  %1087 = vrot.lane.b32.xlu1 %v895_v46, %s1429_s30 }
 0x252   : > { %v1004_v61 = vpop.permute.xlu0 %1003  ;;  %v950_v31 = vpop.permute.xlu1 %949 }
 0x254   : > { %985 = vrot.lane.b32.xlu0 %v779_v9, %s1429_s30  ;;  %1001 = vrot.lane.b32.xlu1 %v777_v55, %s1429_s30 }
 0x258   : > { %1035 = vrot.lane.b32.xlu0 %v826_v3, %s1429_s30  ;;  %1055 = vrot.lane.b32.xlu1 %v855_v63, %s1429_s30 }
 0x25a   : > { %v954_v13 = vpop.permute.xlu0 %953 }
 0x25c   : > { %999 = vrot.lane.b32.xlu0 %v784_v8, %s1429_s30  ;;  %989 = vrot.lane.b32.xlu1 %v1803_v40, %s1429_s30  ;;  %v899_v40 = vsel %vm898_vm1, %v1809_v15, %v1811_v41 }
 0x25e   : > { %v1022_v1 = vpop.permute.xlu0 %1021 }
 0x260   : > { %1089 = vrot.lane.b32.xlu0 %v903_v10, %s1429_s30  ;;  %1085 = vrot.lane.b32.xlu1 %v902_v28, %s1429_s30 }
 0x262   : > { %v1948_v17 = vpop.permute.xlu0 %967  ;;  %v1040_v19 = vpop.permute.xlu1 %1039 }
 0x264   : > { %1077 = vrot.lane.b32.xlu0 %v899_v40, %s1429_s30  ;;  %1037 = vrot.lane.b32.xlu1 %v827_v2, %s1429_s30 }
 0x266   : > { %v1062_v21 = vpop.permute.xlu0 %1061  ;;  %v1008_v18 = vpop.permute.xlu1 %1007 }
 0x268   : > { %981 = vrot.lane.b32.xlu0 %v756_v5, %s1429_s30  ;;  %1081 = vrot.lane.b32.xlu1 %v1847_v26, %s1429_s30  ;;  %v1414_v26 = vld [vmem:[%s2151_s6 + $0xc] ss:$16 sps:$4 sm:$0x3f]  }
 0x269   : > { %1378 = vmatprep.mubr.msk.bf16.mxu0 %vm1201_vm2, %v1414_v26 }
 0x26a   : > { %v1006_v22 = vpop.permute.xlu0 %1005  ;;  %v952_v14 = vpop.permute.xlu1 %951 }
 0x26b   : > { %v1966_v30 = vsel %vm690_vm10, %v952_v14, %v954_v13  ;;  %v1969_v32 = vsel %vm690_vm10, %v950_v31, %v952_v14  ;;  %v1972_v27 = vsel %vm690_vm10, %v1006_v22, %v1008_v18  ;;  %v1975_v16 = vsel %vm690_vm10, %v1004_v61, %v1006_v22 }
 0x26c   : > { %979 = vrot.lane.b32.xlu0 %v755_v54, %s1429_s30  ;;  %1091 = vrot.lane.b32.xlu1 %v904_v58, %s1429_s30 }
 0x26e   : > { %v970_v33 = vpop.permute.xlu0 %969  ;;  %v1060_v34 = vpop.permute.xlu1 %1059 }
 0x26f   : > { %v1986_v35 = vsel %vm690_vm10, %v1058_v7, %v1060_v34  ;;  %v1989_v36 = vsel %vm690_vm10, %v1060_v34, %v1062_v21  ;;  %v1105_v13 = vsel %vm690_vm10, %v1948_v17, %v970_v33 }
 0x270   : > { %983 = vrot.lane.b32.xlu1 %v749_v60, %s1429_s30 }
 0x272   : > { %v1024_v37 = vpop.permute.xlu0 %1023  ;;  %v972_v24 = vpop.permute.xlu1 %971 }
 0x273   : > { %v1996_v38 = vsel %vm690_vm10, %v1022_v1, %v1024_v37  ;;  %v1106_v63 = vsel %vm690_vm10, %v970_v33, %v972_v24 }
 0x274   : > { %1079 = vrot.lane.b32.xlu1 %v900_v12, %s1429_s30 }
 0x276   : > { %v1042_v6 = vpop.permute.xlu0 %1041  ;;  %v1026_v42 = vpop.permute.xlu1 %1025 }
 0x277   : > { %v2000_v4 = vsel %vm690_vm10, %v1040_v19, %v1042_v6  ;;  %v2003_v43 = vsel %vm690_vm10, %v1024_v37, %v1026_v42 }
 0x278   : > { %1075 = vrot.lane.b32.xlu1 %v1809_v15, %s1429_s30 }
 0x27a   : > { %v2007_v46 = vpop.permute.xlu0 %1063  ;;  %v1044_v47 = vpop.permute.xlu1 %1043 }
 0x27b   : > { %v2010_v29 = vsel %vm690_vm10, %v1042_v6, %v1044_v47 }
 0x27e   : > { %v1010_v41 = vpop.permute.xlu0 %1009  ;;  %v960_v48 = vpop.permute.xlu1 %959 }
 0x282   : > { %v956_v49 = vpop.permute.xlu0 %955  ;;  %v2012_v50 = vpop.permute.xlu1 %1045 }
 0x286   : > { %v958_v51 = vpop.permute.xlu0 %957  ;;  %v1014_v52 = vpop.permute.xlu1 %1013 }
 0x287   : > { %v1102_v20 = vsel %vm690_vm10, %v958_v51, %v960_v48  ;;  %v1101_v34 = vsel %vm690_vm10, %v956_v49, %v958_v51  ;;  %v1095_v49 = vsel %vm690_vm10, %v1772_v62, %v1845_v0 }
 0x28a   : > { %v1066_v55 = vpop.permute.xlu0 %1065  ;;  %v974_v56 = vpop.permute.xlu1 %973 }
 0x28e   : > { %v1012_v23 = vpop.permute.xlu0 %1011  ;;  %v1068_v57 = vpop.permute.xlu1 %1067 }
 0x28f   : > { %v2015_v59 = vsel %vm690_vm10, %v1012_v23, %v1014_v52  ;;  %v2018_v15 = vsel %vm690_vm10, %v1010_v41, %v1012_v23  ;;  %v1097_v41 = vsel %vm690_vm10, %v1772_v62, %v1889_v39  ;;  %v1094_v39 = vsel %vm690_vm10, %v1817_v44, %v1819_v45 }
 0x292   : > { %v978_v11 = vpop.permute.xlu0 %977  ;;  %v976_v60 = vpop.permute.xlu1 %975 }
 0x293   : > { %v1108_v9 = vsel %vm690_vm10, %v976_v60, %v978_v11  ;;  %v1107_v61 = vsel %vm690_vm10, %v974_v56, %v976_v60 }
 0x294   : > { %1205 = vmatprep.subr.bf16.mxu1 %v1108_v9 }
 0x295   : > { %1206 = vmatpush1.bf16.msra.mxu1 %v1107_v61 }
 0x296   : > { %v2023_v3 = vpop.permute.xlu0 %1047  ;;  %1207 = vmatprep.subr.bf16.mxu1 %v1106_v63  ;;  %v2025_v7 = vpop.permute.xlu1 %1049 }
 0x299   : > { %1208 = vmatpush1.bf16.msra.mxu1 %v1105_v13 }
 0x29a   : > { %v2029_v8 = vpop.permute.xlu0 %1029  ;;  %v2031_v31 = vpop.permute.xlu1 %1031 }
 0x29e   : > { %v2033_v1 = vpop.permute.xlu0 %1015  ;;  %v1070_v28 = vpop.permute.xlu1 %1069 }
 0x2a2   : > { %v966_v10 = vpop.permute.xlu0 %965  ;;  %v962_v19 = vpop.permute.xlu1 %961 }
 0x2a6   : > { %v2035_v2 = vpop.permute.xlu0 %993  ;;  %v1052_v40 = vpop.permute.xlu1 %1051 }
 0x2aa   : > { %v2037_v21 = vpop.permute.xlu0 %991  ;;  %v1020_v18 = vpop.permute.xlu1 %1019 }
 0x2ae   : > { %v1072_v5 = vpop.permute.xlu0 %1071  ;;  %v2039_v54 = vpop.permute.xlu1 %1033 }
 0x2af   : > { %v1139_v47 = vsel %vm690_vm10, %v1070_v28, %v1072_v5 }
 0x2b2   : > { %v2041_v17 = vpop.permute.xlu0 %987  ;;  %v964_v58 = vpop.permute.xlu1 %963 }
 0x2b3   : > { %v1104_v22 = vsel %vm690_vm10, %v964_v58, %v966_v10  ;;  %v1103_v14 = vsel %vm690_vm10, %v962_v19, %v964_v58 }
 0x2b4   : > { %1209 = vmatprep.subr.bf16.mxu1 %v1104_v22 }
 0x2b5   : > { %1210 = vmatpush1.bf16.msra.mxu1 %v1103_v14 }
 0x2b6   : > { %v1018_v26 = vpop.permute.xlu0 %1017  ;;  %1211 = vmatprep.subr.bf16.mxu1 %v1102_v20  ;;  %v2046_v33 = vpop.permute.xlu1 %1027 }
 0x2b7   : > { %v1121_v56 = vsel %vm690_vm10, %v2033_v1, %v1018_v26 }
 0x2b9   : > { %1212 = vmatpush1.bf16.msra.mxu1 %v1101_v34 }
 0x2ba   : > { %v2049_v37 = vpop.permute.xlu0 %997  ;;  %1213 = vmatprep.subr.bf16.mxu1 %v1966_v30  ;;  %v2052_v24 = vpop.permute.xlu1 %995  ;;  %v1138_v30 = vsel %vm690_vm10, %v1066_v55, %v1068_v57 }
 0x2bd   : > { %1214 = vmatpush1.bf16.msra.mxu1 %v1969_v32  ;;  %v1137_v32 = vsel %vm690_vm10, %v2007_v46, %v1066_v55  ;;  %v1093_v46 = vsel %vm690_vm10, %v1772_v62, %v1817_v44  ;;  %v1132_v62 = vsel %vm690_vm10, %v2023_v3, %v2025_v7  ;;  %v1113_v7 = vsel %vm690_vm10, %v2037_v21, %v2035_v2 }
 0x2be   : > { %v1054_v12 = vpop.permute.xlu0 %1053  ;;  %1215 = vmatprep.subr.bf16.mxu1 %v1912_v53  ;;  %v1074_v6 = vpop.permute.xlu1 %1073 }
 0x2bf   : > { %v1140_v42 = vsel %vm690_vm10, %v1072_v5, %v1074_v6  ;;  %v1133_v45 = vsel %vm690_vm10, %v1052_v40, %v1054_v12 }
 0x2c0   : > { %1248 = vmatprep.subr.bf16.mxu0 %v1140_v42 }
 0x2c1   : > { %1216 = vmatpush1.bf16.msra.mxu1 %v1097_v41  ;;  %1249 = vmatpush1.bf16.msra.mxu0 %v1139_v47 }
 0x2c2   : > { %v2062_v48 = vpop.permute.xlu0 %1083  ;;  %1217 = vmatprep.subr.bf16.mxu1 %v1869_v25  ;;  %1250 = vmatprep.subr.bf16.mxu0 %v1138_v30  ;;  %v1088_v53 = vpop.permute.xlu1 %1087 }
 0x2c5   : > { %1218 = vmatpush1.bf16.msra.mxu1 %v1095_v49  ;;  %1251 = vmatpush1.bf16.msra.mxu0 %v1137_v32 }
 0x2c6   : > { %v2073_v51 = vpop.permute.xlu0 %985  ;;  %1219 = vmatprep.subr.bf16.mxu1 %v1094_v39  ;;  %1252 = vmatprep.subr.bf16.mxu0 %v1989_v36  ;;  %v1002_v25 = vpop.permute.xlu1 %1001  ;;  %v1122_v36 = vsel %vm690_vm10, %v1018_v26, %v1020_v18  ;;  %v1409_v18 = vld [vmem:[%s2151_s6] ss:$16 sps:$4 sm:$0x3f]  }
 0x2c7   : > { %v1111_v28 = vsel %vm690_vm10, %v2073_v51, %v2041_v17 }
 0x2c9   : > { %1220 = vmatpush1.bf16.msra.mxu1 %v1093_v46  ;;  %1253 = vmatpush1.bf16.msra.mxu0 %v1986_v35 }
 0x2ca   : > { %v1036_v0 = vpop.permute.xlu0 %1035  ;;  %1221 = vmatprep.subr.bf16.mxu1 %v2003_v43  ;;  %v1056_v52 = vpop.permute.xlu1 %1055  ;;  %v1131_v43 = vsel %vm690_vm10, %v2012_v50, %v2023_v3 }
 0x2cb   : > { %v1134_v55 = vsel %vm690_vm10, %v1054_v12, %v1056_v52  ;;  %v1127_v11 = vsel %vm690_vm10, %v2039_v54, %v1036_v0 }
 0x2cc   : > { %1254 = vmatprep.subr.bf16.mxu0 %v1134_v55 }
 0x2cd   : > { %1222 = vmatpush2.bf16.msra.mxu1 %v1996_v38  ;;  %1255 = vmatpush1.bf16.msra.mxu0 %v1133_v45 }
 0x2ce   : > { %v1000_v44 = vpop.permute.xlu0 %999  ;;  %1223 = vmatprep.subr.bf16.mxu1 %v1122_v36  ;;  %1256 = vmatprep.subr.bf16.mxu0 %v1132_v62  ;;  %v990_v35 = vpop.permute.xlu1 %989 }
 0x2cf   : > { %v1112_v13 = vsel %vm690_vm10, %v2041_v17, %v990_v35  ;;  %v1412_v17 = vld [vmem:[%s2151_s6 + $0x8] ss:$16 sps:$4 sm:$0x3f]  }
 0x2d1   : > { %1224 = vmatpush2.bf16.msra.mxu1 %v1121_v56  ;;  %1257 = vmatpush1.bf16.msra.mxu0 %v1131_v43 }
 0x2d2   : > { %1225 = vmatprep.subr.bf16.mxu1 %v2015_v59  ;;  %1258 = vmatprep.subr.bf16.mxu0 %v2010_v29  ;;  %v1086_v38 = vpop.permute.xlu1 %1085  ;;  %v1090_v23 = vpop.permute.xlu0 %1089  ;;  %v1116_v29 = vsel %vm690_vm10, %v1000_v44, %v1002_v25  ;;  %v1126_v59 = vsel %vm690_vm10, %v2029_v8, %v2031_v31 }
 0x2d3   : > { %v1145_v3 = vsel %vm690_vm10, %v1088_v53, %v1090_v23 }
 0x2d5   : > { %1226 = vmatpush2.bf16.msra.mxu1 %v2018_v15  ;;  %1259 = vmatpush1.bf16.msra.mxu0 %v2000_v4  ;;  %v1125_v4 = vsel %vm690_vm10, %v2046_v33, %v2029_v8  ;;  %v1115_v15 = vsel %vm690_vm10, %v2049_v37, %v1000_v44  ;;  %v1144_v8 = vsel %vm690_vm10, %v2062_v48, %v1086_v38 }
 0x2d6   : > { %1227 = vmatprep.subr.bf16.mxu1 %v1972_v27  ;;  %v1038_v57 = vpop.permute.xlu1 %1037  ;;  %v1078_v60 = vpop.permute.xlu0 %1077 }
 0x2d7   : > { %v1128_v50 = vsel %vm690_vm10, %v1036_v0, %v1038_v57 }
 0x2d8   : > { %1260 = vmatprep.subr.bf16.mxu0 %v1128_v50 }
 0x2d9   : > { %1228 = vmatpush2.bf16.msra.mxu1 %v1975_v16  ;;  %1261 = vmatpush1.bf16.msra.mxu0 %v1127_v11  ;;  %v1114_v16 = vsel %vm690_vm10, %v2035_v2, %v2052_v24 }
 0x2da   : > { %1229 = vmatprep.subr.bf16.mxu1 %v1116_v29  ;;  %1262 = vmatprep.subr.bf16.mxu0 %v1126_v59  ;;  %v1082_v27 = vpop.permute.xlu1 %1081  ;;  %v982_v61 = vpop.permute.xlu0 %981 }
 0x2db   : > { %v1143_v1 = vsel %vm690_vm10, %v1082_v27, %v2062_v48 }
 0x2dd   : > { %1230 = vmatpush2.bf16.msra.mxu1 %v1115_v15  ;;  %1263 = vmatpush1.bf16.msra.mxu0 %v1125_v4 }
 0x2de   : > { %1231 = vmatprep.subr.bf16.mxu1 %v1114_v16  ;;  %v1092_v9 = vpop.permute.xlu1 %1091  ;;  %v980_v10 = vpop.permute.xlu0 %979 }
 0x2df   : > { %v1146_v63 = vsel %vm690_vm10, %v1090_v23, %v1092_v9  ;;  %v1109_v21 = vsel %vm690_vm10, %v980_v10, %v982_v61 }
 0x2e0   : > { %1274 = vmatprep.subr.bf16.mxu0 %v1146_v63 }
 0x2e1   : > { %1232 = vmatpush2.bf16.msra.mxu1 %v1113_v7  ;;  %1275 = vmatpush2.bf16.msra.mxu0 %v1145_v3 }
 0x2e2   : > { %1233 = vmatprep.subr.bf16.mxu1 %v1112_v13  ;;  %1276 = vmatprep.subr.bf16.mxu0 %v1144_v8  ;;  %v984_v31 = vpop.permute.xlu1 %983 }
 0x2e3   : > { %v1110_v19 = vsel %vm690_vm10, %v982_v61, %v984_v31 }
 0x2e5   : > { %1234 = vmatpush2.bf16.msra.mxu1 %v1111_v28  ;;  %1277 = vmatpush2.bf16.msra.mxu0 %v1143_v1 }
 0x2e6   : > { %1235 = vmatprep.subr.bf16.mxu1 %v1110_v19  ;;  %v1080_v2 = vpop.permute.xlu1 %1079 }
 0x2e7   : > { %v1142_v40 = vsel %vm690_vm10, %v1078_v60, %v1080_v2 }
 0x2e8   : > { %1278 = vmatprep.subr.bf16.mxu0 %v1142_v40 }
 0x2e9   : > { %1236 = vmatpush2.bf16.msra.mxu1 %v1109_v21 }
 0x2ea   : > { %v1076_v5 = vpop.permute.xlu1 %1075 }
 0x2eb   : > { %v1141_v54 = vsel %vm690_vm10, %v1076_v5, %v1078_v60 }
 0x2ec   : > { %1238 = vmatmul.mubr.bf16.vlgmr.msra.gmra.mxu1 %v1409_v18  ;;  %1279 = vmatpush2.bf16.msra.mxu0 %v1141_v54 }
 0x2ef   : > { %1281 = vmatmul.mubr.bf16.vlgmr.msra.gmra.mxu0 %v1412_v17 }
 0x3ac   : > { %v1239_v58 = vpop.f32.mrf.mxu1 }
 0x3ae   : > { %v1241_v22 = vpop.f32.mrf.mxu1 }
 0x3af   : > { %v1282_v14 = vpop.f32.mrf.mxu0 }
 0x3b0   : > { %v1283_v20 = vadd.f32 %v1282_v14, %v1239_v58  ;;  %v1243_v26 = vpop.f32.mrf.mxu1 }
 0x3b1   : > { %v1284_v33 = vpop.f32.mrf.mxu0 }
 0x3b2   : > { %1297 = vst [vmem:[%s1518_s21 + $0x30] sm:$0xff] %v1283_v20  ;;  %v1285_v34 = vadd.f32 %v1284_v33, %v1241_v22  ;;  %v1245_v12 = vpop.f32.mrf.mxu1 }
 0x3b3   : > { %v1286_v37 = vpop.f32.mrf.mxu0 }
 0x3b4   : > { %1298 = vst [vmem:[%s1518_s21 + $0x38] sm:$0xff] %v1285_v34  ;;  %v1287_v24 = vadd.f32 %v1286_v37, %v1243_v26 }
 0x3b5   : > { %v1288_v6 = vpop.f32.mrf.mxu0 }
 0x3b6   : > { %1299 = vst [vmem:[%s1518_s21 + $0x40] sm:$0xf] %v1287_v24  ;;  %v1289_v42 = vadd.f32 %v1288_v6, %v1245_v12 }
 0x3b8   : > { %1300 = vst [vmem:[%s1518_s21 + $0x48] sm:$0xf] %v1289_v42 }
 0x3b9 PF: > { %s17_s24 = sadd.s32 1, %s1421_s24  }
 0x3ba   : > { %p14_p4 = scmp.ge.s32.totalorder %s17_s24, 4  }
 0x3bc   :  { %16 = sbr.rel (!%p14_p4) target bundleno = 1 (0x1), region = 78 }

</bundles_post_ra>
